<compile_context>
chip_gen: v7x
topology: tpu7x:2x2x1
jax: 0.10.0
libtpu: 0.0.40
codegen_flags: <defaults>
</compile_context>

<pallas_src>
import jax
import jax.numpy as jnp
from jax.experimental import pallas as pl
from jax.experimental.pallas import tpu as pltpu


def _bn_mean_kernel(x_ref, scale_ref, shift_ref, o_ref, acc_ref):
    # x_ref:     (block_n, block_ch, W)  input tile (NCHW flattened to N, C*H, W)
    # scale_ref: (1, block_ch)           gamma / sqrt(var+eps) / (N*W), per (c,h)
    # shift_ref: (1, block_ch)           beta - mean * gamma / sqrt(var+eps)
    # o_ref:     (1, block_ch)           output slab (revisited across the N axis)
    # acc_ref:   (1, block_ch) f32       running sum over (N, W)
    n = pl.program_id(1)

    @pl.when(n == 0)
    def _():
        acc_ref[...] = jnp.zeros_like(acc_ref)

    x = x_ref[...].astype(jnp.float32)                        # (bn, bch, W)
    # Batch-tile sum first: pure VPU vreg adds, no cross-lane work.
    xsum_n = jnp.sum(x, axis=0, keepdims=True)                # (1, bch, W)
    # Single lane (XLU) reduce over W per (c,h) row.
    partial = jnp.sum(xsum_n, axis=-1)                        # (1, bch)
    acc_ref[...] += partial

    @pl.when(n == pl.num_programs(1) - 1)
    def _():
        # Affine + 1/(N*W) applied once, post-reduction (exact: BN is linear).
        o_ref[...] = acc_ref[...] * scale_ref[...] + shift_ref[...]


def _vmem_capacity_bytes():
    """Physical VMEM per TensorCore; conservative fallback if query unavailable."""
    try:
        return int(pltpu.get_tpu_info().vmem_capacity_bytes)
    except Exception:
        return 64 * 1024 * 1024  # v7x per-TC size: safe lower bound


def _vmem_plan():
    """Per-input-buffer tile budget and explicit scoped-VMEM limit.

    v5e/v6e (128 MiB): 32 MiB per buffer, limit 72 MiB (overrides v5e's 16 MiB
    scoped default).  v7x (64 MiB): 16 MiB per buffer, limit 40 MiB.
    """
    cap = _vmem_capacity_bytes()
    per_buffer = min(32 * 1024 * 1024, cap // 4)
    limit = min(cap - cap // 8, 2 * per_buffer + 8 * 1024 * 1024)
    return per_buffer, int(limit)


def _pick_tiles(n, ch, w, itemsize, per_buffer_budget):
    """Pick (block_ch, block_n).

    block_ch: lane-dense divisor of CH (multiple of 128 when possible), capped so
      (a) a single-n slab block_ch*W*itemsize fits the per-buffer budget and
      (b) the parallel CH axis has >= 2 steps when CH % 256 == 0 (feeds both
          v7x TensorCores; harmless on single-TC chips).
    block_n: largest divisor of N whose tile stays under the per-buffer budget
      (double-buffered by BlockSpec, covered by vmem_limit_bytes).
    """
    if ch % 128 == 0:
        candidates = [c for c in (4096, 2048, 1024, 512, 256, 128) if ch % c == 0]
        if ch % 256 == 0:
            two_step = [c for c in candidates if ch // c >= 2]
            if two_step:
                candidates = two_step
        block_ch = None
        for c in candidates:  # descending: largest lane-dense tile that fits budget
            if c * w * itemsize <= per_buffer_budget:
                block_ch = c
                break
        if block_ch is None:
            block_ch = candidates[-1]
    else:
        block_ch = ch  # small / odd shapes: take the full axis (toy case: 16)

    per_n = max(1, block_ch * w * itemsize)
    block_n = max(1, min(n, per_buffer_budget // per_n))
    while n % block_n:
        block_n -= 1
    return block_ch, block_n


def batch_sample_model(x, gamma, beta, running_mean, running_var, eps=1e-5):
    """Pallas implementation of BatchSampleModel.forward (eval-mode BN + means)."""
    N, C, H, W = x.shape
    CH = C * H
    itemsize = x.dtype.itemsize

    # Fold eval-mode BN affine and the 1/(N*W) mean factor into per-(c,h) vectors.
    scale_c = (gamma / jnp.sqrt(running_var + eps)).astype(jnp.float32)   # (C,)
    shift_c = (beta.astype(jnp.float32) -
               running_mean.astype(jnp.float32) * scale_c)                # (C,)
    scale_vec = jnp.repeat(scale_c / (N * W), H).reshape(1, CH)
    shift_vec = jnp.repeat(shift_c, H).reshape(1, CH)

    # Free reshape of contiguous NCHW: (N, C, H, W) -> (N, C*H, W).
    x2d = x.reshape(N, CH, W)

    per_buffer_budget, vmem_limit = _vmem_plan()
    block_ch, block_n = _pick_tiles(N, CH, W, itemsize, per_buffer_budget)
    grid = (CH // block_ch, N // block_n)

    cost = pl.CostEstimate(
        flops=2 * N * CH * W,
        transcendentals=0,
        bytes_accessed=N * CH * W * itemsize + 3 * CH * 4,
    )

    out_flat = pl.pallas_call(
        _bn_mean_kernel,
        out_shape=jax.ShapeDtypeStruct((1, CH), jnp.float32),
        grid=grid,
        in_specs=[
            pl.BlockSpec((block_n, block_ch, W), lambda c, n: (n, c, 0)),
            pl.BlockSpec((1, block_ch), lambda c, n: (0, c)),
            pl.BlockSpec((1, block_ch), lambda c, n: (0, c)),
        ],
        out_specs=pl.BlockSpec((1, block_ch), lambda c, n: (0, c)),
        scratch_shapes=[pltpu.VMEM((1, block_ch), jnp.float32)],
        compiler_params=pltpu.CompilerParams(
            dimension_semantics=("parallel", "arbitrary"),
            vmem_limit_bytes=vmem_limit),
        cost_estimate=cost,
    )(x2d, scale_vec, shift_vec)

    return out_flat.reshape(C, H)


if __name__ == "__main__":
    key = jax.random.PRNGKey(0)

    # BatchNorm2d(num_features=1): input is NCHW with C=1.
    N, C, H, W = 2, 1, 16, 16
    x = jax.random.normal(key, (N, C, H, W), dtype=jnp.float32)

    # Parameters matching the module's __init__ / BatchNorm2d defaults:
    gamma = jnp.ones((C,), jnp.float32)
    beta = jnp.zeros((C,), jnp.float32)
    running_mean = jnp.zeros((C,), jnp.float32)   # set explicitly to [0.0]
    running_var = jnp.ones((C,), jnp.float32)     # set explicitly to [1.0]

    out = batch_sample_model(x, gamma, beta, running_mean, running_var)
    out = jax.block_until_ready(out)

    # Pure-JAX reference.
    eps = 1e-5
    y_ref = (x - running_mean.reshape(1, C, 1, 1)) / jnp.sqrt(
        running_var.reshape(1, C, 1, 1) + eps)
    y_ref = y_ref * gamma.reshape(1, C, 1, 1) + beta.reshape(1, C, 1, 1)
    ref = jnp.mean(jnp.mean(y_ref, axis=-1), axis=0)

    assert out.shape == (C, H), out.shape
    assert jnp.allclose(out, ref, atol=1e-5, rtol=1e-5)

    print("KERNEL_OK")
</pallas_src>

<mosaic_0001>
module attributes {stable_mosaic.version = 11 : i64} {
  func.func @_bn_mean_kernel(%arg0: i32, %arg1: i32, %arg2: memref<2x16x16xf32, #tpu.memory_space<vmem>>, %arg3: memref<1x16xf32, #tpu.memory_space<vmem>>, %arg4: memref<1x16xf32, #tpu.memory_space<vmem>>, %arg5: memref<1x16xf32, #tpu.memory_space<vmem>>, %arg6: memref<1x16xf32, #tpu.memory_space<vmem>>) attributes {dimension_semantics = [#tpu.dimension_semantics<parallel>, #tpu.dimension_semantics<arbitrary>], iteration_bounds = array<i64: 1, 1>, scalar_prefetch = 0 : i64, scratch_operands = 1 : i64, tpu.core_type = #tpu.core_type<tc>, window_params = [{transform_indices = @transform_0, window_bounds = array<i64: 2, 16, 16>}, {transform_indices = @transform_1, window_bounds = array<i64: 1, 16>}, {transform_indices = @transform_2, window_bounds = array<i64: 1, 16>}, {transform_indices = @transform_3, window_bounds = array<i64: 1, 16>}]} {
    %c0_i32 = arith.constant 0 : i32
    %0 = arith.cmpi eq, %arg1, %c0_i32 : i32
    %1 = arith.extui %0 : i1 to i32
    %c0_i32_0 = arith.constant 0 : i32
    %2 = arith.cmpi ne, %1, %c0_i32_0 : i32
    scf.if %2 {
      %cst_10 = arith.constant 0.000000e+00 : f32
      %13 = vector.broadcast %cst_10 : f32 to vector<1x16xf32>
      %c0_11 = arith.constant 0 : index
      %c0_12 = arith.constant 0 : index
      %14 = vector.load %arg6[%c0_11, %c0_12] : memref<1x16xf32, #tpu.memory_space<vmem>>, vector<1x16xf32>
      tpu.vector_store %arg6[%c0_11, %c0_12], %13 {strides = array<i32>} : memref<1x16xf32, #tpu.memory_space<vmem>>, vector<1x16xf32>,
    } else {
    }
    %c0 = arith.constant 0 : index
    %c0_1 = arith.constant 0 : index
    %c0_2 = arith.constant 0 : index
    %3 = vector.load %arg2[%c0, %c0_1, %c0_2] : memref<2x16x16xf32, #tpu.memory_space<vmem>>, vector<2x16x16xf32>
    %cst = arith.constant dense<0.000000e+00> : vector<16x16xf32>
    %4 = vector.multi_reduction <add>, %3, %cst [0] : vector<2x16x16xf32> to vector<16x16xf32>
    %5 = vector.shape_cast %4 : vector<16x16xf32> to vector<1x16x16xf32>
    %cst_3 = arith.constant dense<0.000000e+00> : vector<1x16xf32>
    %6 = vector.multi_reduction <add>, %5, %cst_3 [2] : vector<1x16x16xf32> to vector<1x16xf32>
    %c0_4 = arith.constant 0 : index
    %c0_5 = arith.constant 0 : index
    %7 = vector.load %arg6[%c0_4, %c0_5] : memref<1x16xf32, #tpu.memory_space<vmem>>, vector<1x16xf32>
    %8 = arith.addf %7, %6 : vector<1x16xf32>
    %c0_6 = arith.constant 0 : index
    %c0_7 = arith.constant 0 : index
    %9 = vector.load %arg6[%c0_6, %c0_7] : memref<1x16xf32, #tpu.memory_space<vmem>>, vector<1x16xf32>
    tpu.vector_store %arg6[%c0_6, %c0_7], %8 {strides = array<i32>} : memref<1x16xf32, #tpu.memory_space<vmem>>, vector<1x16xf32>,
    %c0_i32_8 = arith.constant 0 : i32
    %10 = arith.cmpi eq, %arg1, %c0_i32_8 : i32
    %11 = arith.extui %10 : i1 to i32
    %c0_i32_9 = arith.constant 0 : i32
    %12 = arith.cmpi ne, %11, %c0_i32_9 : i32
    scf.if %12 {
      %c0_10 = arith.constant 0 : index
      %c0_11 = arith.constant 0 : index
      %13 = vector.load %arg6[%c0_10, %c0_11] : memref<1x16xf32, #tpu.memory_space<vmem>>, vector<1x16xf32>
      %c0_12 = arith.constant 0 : index
      %c0_13 = arith.constant 0 : index
      %14 = vector.load %arg3[%c0_12, %c0_13] : memref<1x16xf32, #tpu.memory_space<vmem>>, vector<1x16xf32>
      %15 = arith.mulf %13, %14 : vector<1x16xf32>
      %c0_14 = arith.constant 0 : index
      %c0_15 = arith.constant 0 : index
      %16 = vector.load %arg4[%c0_14, %c0_15] : memref<1x16xf32, #tpu.memory_space<vmem>>, vector<1x16xf32>
      %17 = arith.addf %15, %16 : vector<1x16xf32>
      %c0_16 = arith.constant 0 : index
      %c0_17 = arith.constant 0 : index
      %18 = vector.load %arg5[%c0_16, %c0_17] : memref<1x16xf32, #tpu.memory_space<vmem>>, vector<1x16xf32>
      tpu.vector_store %arg5[%c0_16, %c0_17], %17 {strides = array<i32>} : memref<1x16xf32, #tpu.memory_space<vmem>>, vector<1x16xf32>,
    } else {
    }
    return
  }
  func.func @transform_0(%arg0: i32, %arg1: i32) -> (i32, i32, i32) {
    %c0_i32 = arith.constant 0 : i32
    %c0_i32_0 = arith.constant 0 : i32
    return %arg1, %arg0, %c0_i32 : i32, i32, i32
  }
  func.func @transform_1(%arg0: i32, %arg1: i32) -> (i32, i32) {
    %c0_i32 = arith.constant 0 : i32
    %c0_i32_0 = arith.constant 0 : i32
    return %c0_i32, %arg0 : i32, i32
  }
  func.func @transform_2(%arg0: i32, %arg1: i32) -> (i32, i32) {
    %c0_i32 = arith.constant 0 : i32
    %c0_i32_0 = arith.constant 0 : i32
    return %c0_i32, %arg0 : i32, i32
  }
  func.func @transform_3(%arg0: i32, %arg1: i32) -> (i32, i32) {
    %c0_i32 = arith.constant 0 : i32
    %c0_i32_0 = arith.constant 0 : i32
    return %c0_i32, %arg0 : i32, i32
  }
}

</mosaic_0001>

<bundles_post_ra>
// kernel: tpu_custom_call.1
= control target key start
LH: loop header
LB: loop body
LE: loop exit
PB: predicated region body
PF: predicated region fallthrough
CT: control target
= control target key end

     0   :  { %8 = vsyncpa [#allocation4], 0  ;;  %s408_s0 = inlined_call_operand.hbm [shape: f32[2,16,16], index: 0, kind: input, shape index: {}]   ;;  %s409_s1 = inlined_call_operand.vmem [shape: f32[1,16], index: 1, kind: input, shape index: {}]   ;;  %s410_s2 = inlined_call_operand.vmem [shape: f32[1,16], index: 2, kind: input, shape index: {}]   ;;  %s411_s3 = inlined_call_operand.hbm [shape: f32[1,16], index: 3, kind: output, shape index: {}]  }
   0x1   :  { %9 = vsyncpa [#allocation5], 0  ;;  %s335_s12 = smov [#allocation3]   ;;  %s287_s16 = scalar_lea.hbm %s408_s0, 512 }
   0x2   :  { %s15_s13 = sshll.u32 %s335_s12, 4  ;;  %p288_p0 = scmp.ne.s32.totalorder %s408_s0, %s287_s16  ;;  %s16_s13 = int_to_ptr.vmem [resolvable:$true] %s15_s13 }
   0x3   :  { %p291_p1 = scmp.lt.u32.totalorder %s287_s16, %s408_s0 }
   0x5   :  { %p293_p2 = pnand %p291_p1, %p288_p0 }
   0x7   :  { %296 = shalt.err (!%p293_p2)
}
   0x8   :  { %s297_s21 = scalar_lea.vmem %s16_s13, 512  ;;  %p302_p4 = scmp.lt.s32.totalorder %s16_s13, %s16_s13 }
   0x9   :  { %p298_p3 = scmp.ne.s32.totalorder %s16_s13, %s297_s21  ;;  %p303_p5 = scmp.lt.s32.totalorder %s297_s21, %s297_s21 }
   0xb   :  { %p304_p6 = por %p303_p5, %p302_p4 }
   0xd   :  { %p305_p7 = pnand %p304_p6, %p298_p3 }
   0xf   :  { %308 = shalt.err (!%p305_p7)
}
  0x10   :  { %s336_s22 = smov 128   ;;  %s337_s23 = smov 8  }
  0x11   :  { %21 = dma.hbm_to_vmem [thread:$0]  %s408_s0, 512, %s16_s13, [#allocation4], %s336_s22, %s336_s22, %s337_s23  }
  0x12   :  { %331 = dma.done.wait [#allocation4], 512  }
  0x13   :  { %332 = vsyncadd [#allocation4], 4294966784  ;;  %vm39_vm0 = vcmask 130048   ;;  %v35_v0 = vld [vmem:[#allocation3] sm:$0xff]  ;;  %v37_v1 = vld [vmem:[#allocation3 + $0x10] sm:$0xff]  ;;  %v338_v12 = vmov 0   ;;  %v55_v13 = vlaneseq }
  0x14   :  { %v36_v2 = vld [vmem:[#allocation3 + $0x8] sm:$0xff]  ;;  %v40_v3 = vsel %vm39_vm0, %v35_v0, 0.0  ;;  %v41_v4 = vsel %vm39_vm0, %v37_v1, 0.0  ;;  %v38_v5 = vld [vmem:[#allocation3 + $0x18] sm:$0xff]  ;;  %285 = vset.pattern.permute.xlu1 %v338_v12  ;;  %286 = vset.pattern.permute.xlu0 %v338_v12  ;;  %v339_v14 = vmov 1966171168  }
  0x15   :  { %v43_v6 = vsel %vm39_vm0, %v36_v2, 0.0  ;;  %v42_v7 = vadd.f32 %v41_v4, %v40_v3  ;;  %v44_v8 = vsel %vm39_vm0, %v38_v5, 0.0  ;;  %v124_v15 = vunpack.c.l.s4 %v339_v14  ;;  %s341_s29 = smov [#allocation6]  }
  0x16   :  { %v45_v9 = vadd.f32 %v44_v8, %v43_v6  ;;  %v374_v16 = vshrl.u32 %v55_v13, 7  ;;  %vm33_vm1 = vcmask 122880   ;;  %v224_v8 = vand.u32 127, %v55_v13  ;;  %v258_v13 = vld [vmem:[%s409_s1] sm:$0x1]  ;;  %s269_s30 = sshll.u32 %s341_s29, 4  ;;  %s270_s30 = int_to_ptr.vmem [resolvable:$true] %s269_s30 }
  0x17   :  { %v46_v10 = vsel %vm39_vm0, %v42_v7, 0.0  ;;  %v125_v17 = vunpack.c.0.s8 %v124_v15  ;;  %v340_v7 = vmov 0.0   ;;  %vm234_vm2 = vcmask 130112   ;;  %s309_s4 = scalar_lea.vmem %s270_s30, 16  ;;  %s313_s5 = scalar_lea.vmem %s270_s30, 32 }
  0x18   :  { %47 = vadd.xlane.f32.xlu0 %v46_v10  ;;  %v49_v11 = vsel %vm39_vm0, %v45_v9, 0.0  ;;  %v57_v18 = vsub.s32 0, %v374_v16  ;;  %v61_v19 = vsub.s32 1, %v374_v16  ;;  %v65_v20 = vsub.s32 2, %v374_v16  ;;  %34 = vst.msk [vmem:[#allocation2] sm:$0x1] %vm33_vm1, %v340_v7  ;;  %p310_p8 = scmp.ne.s32.totalorder %s270_s30, %s309_s4  ;;  %p314_p9 = scmp.lt.s32.totalorder %s270_s30, %s270_s30 }
  0x19   :  { %v69_v21 = vsub.s32 3, %v374_v16  ;;  %v73_v22 = vsub.s32 4, %v374_v16  ;;  %v77_v23 = vsub.s32 5, %v374_v16  ;;  %v81_v24 = vsub.s32 6, %v374_v16  ;;  %p315_p10 = scmp.lt.s32.totalorder %s313_s5, %s309_s4 }
  0x1a   :  { %v85_v25 = vsub.s32 7, %v374_v16  ;;  %v128_v27 = vsub.s32 %v125_v17, %v374_v16  ;;  %v229_v9 = vadd.s32 4294967288, %v224_v8 }
  0x1b   :  { %p316_p11 = por %p315_p10, %p314_p9 }
  0x1c   :  { %50 = vadd.xlane.f32.xlu0 %v49_v11  ;;  %v227_v11 = vsub.s32 %v224_v8, %v374_v16  ;;  %v232_v12 = vsub.s32 %v229_v9, %v374_v16  ;;  %v260_v16 = vld [vmem:[%s410_s2] sm:$0x1] }
  0x1d   :  { %p317_p12 = pnand %p316_p11, %p310_p8 }
  0xa5   :  { %v48_v26 = vpop.xlane.xlu0 %47 }
  0xa6   :  { %v58_v28 = vrot.slane %v48_v26, %v57_v18  ;;  %v62_v29 = vrot.slane %v48_v26, %v61_v19  ;;  %v66_v30 = vrot.slane %v48_v26, %v65_v20  ;;  %v70_v31 = vrot.slane %v48_v26, %v69_v21 }
  0xa7   :  { %v74_v32 = vrot.slane %v48_v26, %v73_v22  ;;  %v78_v33 = vrot.slane %v48_v26, %v77_v23  ;;  %v82_v34 = vrot.slane %v48_v26, %v81_v24  ;;  %v86_v35 = vrot.slane %v48_v26, %v85_v25 }
  0xa8   :  { %v119_v36 = vcombine.low %v58_v28, %v62_v29  ;;  %v120_v37 = vcombine.low %v66_v30, %v70_v31 }
  0xa9   :  { %v51_v38 = vpop.xlane.xlu0 %50  ;;  %v121_v39 = vcombine.low %v74_v32, %v78_v33  ;;  %v122_v40 = vcombine.low %v82_v34, %v86_v35 }
  0xaa   :  { %v129_v41 = vrot.slane %v119_v36, %v128_v27  ;;  %v136_v42 = vrot.slane %v120_v37, %v128_v27  ;;  %v90_v43 = vrot.slane %v51_v38, %v57_v18  ;;  %v94_v44 = vrot.slane %v51_v38, %v61_v19 }
  0xab   :  { %v143_v45 = vrot.slane %v121_v39, %v128_v27  ;;  %v150_v46 = vrot.slane %v122_v40, %v128_v27  ;;  %v98_v47 = vrot.slane %v51_v38, %v65_v20  ;;  %v102_v48 = vrot.slane %v51_v38, %v69_v21  ;;  %v52_v20 = vld [vmem:[#allocation2] sm:$0x1] }
  0xac   :  { %v151_v49 = vcombine.low %v129_v41, %v136_v42  ;;  %v106_v50 = vrot.slane %v51_v38, %v73_v22  ;;  %v110_v51 = vrot.slane %v51_v38, %v77_v23  ;;  %v114_v52 = vrot.slane %v51_v38, %v81_v24 }
  0xad   :  { %v152_v53 = vcombine.low %v143_v45, %v150_v46  ;;  %v118_v54 = vrot.slane %v51_v38, %v85_v25  ;;  %v168_v55 = vcombine.low %v90_v43, %v94_v44  ;;  %v169_v56 = vcombine.low %v98_v47, %v102_v48 }
  0xae   :  { %v159_v57 = vrot.slane %v151_v49, %v128_v27  ;;  %v170_v58 = vcombine.low %v106_v50, %v110_v51 }
  0xaf   :  { %v166_v59 = vrot.slane %v152_v53, %v128_v27  ;;  %v171_v60 = vcombine.low %v114_v52, %v118_v54  ;;  %v178_v61 = vrot.slane %v168_v55, %v128_v27  ;;  %v185_v62 = vrot.slane %v169_v56, %v128_v27 }
  0xb0   :  { %v192_v63 = vrot.slane %v170_v58, %v128_v27 }
  0xb1   :  { %v167_v0 = vcombine.low %v159_v57, %v166_v59  ;;  %v199_v1 = vrot.slane %v171_v60, %v128_v27  ;;  %v200_v2 = vcombine.low %v178_v61, %v185_v62 }
  0xb3   :  { %218 = vperm.xlu1 %285, %v167_v0   ;;  %v201_v3 = vcombine.low %v192_v63, %v199_v1  ;;  %v208_v4 = vrot.slane %v200_v2, %v128_v27 }
  0xb5   :  { %v215_v5 = vrot.slane %v201_v3, %v128_v27 }
  0xb7   :  { %v216_v6 = vcombine.low %v208_v4, %v215_v5 }
  0xb9   :  { %221 = vperm.xlu1 %285, %v216_v6  }
 0x132   :  { %v219_v10 = vpop.permute.xlu1 %218 }
 0x133   :  { %v228_v15 = vrot.slane %v219_v10, %v227_v11 }
 0x138   :  { %v222_v14 = vpop.permute.xlu1 %221 }
 0x139   :  { %v233_v17 = vrot.slane %v222_v14, %v232_v12 }
 0x13b   :  { %v235_v18 = vsel %vm234_vm2, %v233_v17, %v228_v15 }
 0x13c   :  { %v242_v19 = vrot.slane %v235_v18, %v128_v27 }
 0x13e   :  { %v249_v21 = vrot.slane %v242_v19, %v128_v27 }
 0x140   :  { %v251_v22 = vadd.f32 %v249_v21, %v52_v20 }
 0x142   :  { %253 = vst.msk [vmem:[#allocation2] sm:$0x1] %vm33_vm1, %v251_v22 }
 0x149   :  { %v257_v23 = vld [vmem:[#allocation2] sm:$0x1] }
 0x14a   :  { %v259_v24 = vmul.f32 %v258_v13, %v257_v23 }
 0x14c   :  { %v261_v25 = vadd.f32 %v260_v16, %v259_v24 }
 0x14e   :  { %262 = vst.msk [vmem:[#allocation6] sm:$0x1] %vm33_vm1, %v261_v25 }
 0x14f   :  { %320 = shalt.err (!%p317_p12)
}
 0x150   :  { %s321_s7 = scalar_lea.hbm %s411_s3, 16 }
 0x151   :  { %p322_p13 = scmp.ne.s32.totalorder %s411_s3, %s321_s7  ;;  %p325_p0 = scmp.lt.u32.totalorder %s321_s7, %s411_s3 }
 0x153   :  { %p327_p1 = pnand %p325_p0, %p322_p13 }
 0x155   :  { %330 = shalt.err (!%p327_p1)
}
 0x156   :  { %272 = dma.vmem_to_hbm [thread:$0]  %s270_s30, 16, %s411_s3, [#allocation5]  }
 0x157   :  { %333 = dma.done.wait [#allocation5], 16  }
 0x158   :  { %334 = vsyncadd [#allocation5], 4294967280 }
 0x159   :  { %276 = vsyncpa [#allocation4], 1 }
 0x15a   :  { %277 = vsyncpa [#allocation5], 1 }

</bundles_post_ra>
